<compile_context>
chip_gen: v5e
topology: v5e:2x2
jax: 0.10.0
libtpu: 0.0.40
codegen_flags: <defaults>
</compile_context>

<pallas_src>
import functools

import jax
import jax.numpy as jnp
from jax import lax
from jax.experimental import pallas as pl
from jax.experimental.pallas import tpu as pltpu


def lstm_y_kernel(k_real, x_ref, wih_ref, b_ref, whh_ref, wof_ref, wob_ref,
                  bout_ref, out_ref):
    T = x_ref.shape[0]
    G = whh_ref.shape[1]          # 8H, columns [i_f i_b | f_f f_b | g_f g_b | o_f o_b]
    H2 = G // 4                   # 2H, each gate slice = [dir_f | dir_b]
    H = H2 // 2
    KP = out_ref.shape[1]         # lane-padded tag width (128)

    # --- Prologue: one fused input projection for both directions. ---------------
    # x_ref row t = [x[t] | x[T-1-t]]; wih_ref is block-diagonal over the direction
    # axis, so xg[t] already holds the fused cell's input pre-activations at step t.
    xg = (jnp.dot(x_ref[...], wih_ref[...], preferred_element_type=jnp.float32)
          + b_ref[...])

    whh = whh_ref[...]            # (2H, 8H) block-diagonal recurrent weights
                                  # (loop-invariant; stays resident across the unroll).

    # Lane mask selecting the g-gate lanes (tanh); everything else is sigmoid.
    # Hoisted out of the loop (broadcasts are not CSE'd by JAX).
    lane = lax.broadcasted_iota(jnp.int32, (1, G), 1)
    g_mask = (lane >= 2 * H2) & (lane < 3 * H2)

    h = jnp.zeros((1, H2), jnp.float32)   # [h_f | h_b]
    c = jnp.zeros((1, H2), jnp.float32)   # [c_f | c_b]
    hf_steps = []                          # h_f at time t
    hb_steps = []                          # h_b at time T-1-t

    # --- Fused, fully-unrolled recurrence (T is a small static constant). --------
    for t in range(T):
        gates = xg[t:t + 1, :] + jnp.dot(h, whh,
                                         preferred_element_type=jnp.float32)
        # Single-tanh gate activation: sigmoid(x) = 0.5*tanh(0.5*x) + 0.5.
        # One EUP pass over the whole (1, 8H) gate vector per step instead of a
        # tanh pass AND a sigmoid pass (where() evaluates both branches).
        pre = jnp.where(g_mask, gates, 0.5 * gates)
        th = jnp.tanh(pre)
        act = jnp.where(g_mask, th, 0.5 * th + 0.5)

        i_g = act[:, 0 * H2:1 * H2]
        f_g = act[:, 1 * H2:2 * H2]
        g_g = act[:, 2 * H2:3 * H2]
        o_g = act[:, 3 * H2:4 * H2]
        c = f_g * c + i_g * g_g
        h = o_g * jnp.tanh(c)
        hf_steps.append(h[:, :H])
        hb_steps.append(h[:, H:])

    # One contiguous (T, H) value per direction, kept in vregs; the backward list is
    # reversed at trace time (free) so both are in time order.
    hf = jnp.concatenate(hf_steps, axis=0)           # (T, H)
    hb = jnp.concatenate(hb_steps[::-1], axis=0)     # (T, H)

    # --- Epilogue: lane-dense hidden2tag (per direction, no lane concat) + softmax.
    tag = (jnp.dot(hf, wof_ref[...], preferred_element_type=jnp.float32)
           + jnp.dot(hb, wob_ref[...], preferred_element_type=jnp.float32)
           + bout_ref[...])                          # (T, 128), cols >= K are 0

    out_lane = lax.broadcasted_iota(jnp.int32, (1, KP), 1)
    tag = jnp.where(out_lane < k_real, tag, -1e30)   # pad lanes -> exp() underflows to 0
    tag = tag - jnp.max(tag, axis=-1, keepdims=True)
    e = jnp.exp(tag)
    denom = jnp.sum(e, axis=-1, keepdims=True)
    # Exact reciprocal: off the hot recurrence path, keeps rows summing to 1.
    out_ref[...] = e * pl.reciprocal(denom, approx=False)


def _interleave_dirs(w_f, w_b):
    """Pack (R,4H)+(R,4H) PyTorch-layout (i,f,g,o) weights into a (2R,8H)
    block-diagonal matrix with columns [i_f i_b f_f f_b g_f g_b o_f o_b]."""
    r_f, h4 = w_f.shape
    r_b = w_b.shape[0]
    h = h4 // 4
    zf = jnp.zeros((r_b, h), w_f.dtype)
    zb = jnp.zeros((r_f, h), w_b.dtype)
    cols = []
    for k in range(4):
        cols.append(jnp.concatenate([w_f[:, k * h:(k + 1) * h], zf], axis=0))
        cols.append(jnp.concatenate([zb, w_b[:, k * h:(k + 1) * h]], axis=0))
    return jnp.concatenate(cols, axis=1)


def _interleave_bias(b_f, b_b):
    """Pack two (1,4H) biases into (1,8H) matching the interleaved column order."""
    h = b_f.shape[1] // 4
    cols = []
    for k in range(4):
        cols.append(b_f[:, k * h:(k + 1) * h])
        cols.append(b_b[:, k * h:(k + 1) * h])
    return jnp.concatenate(cols, axis=1)


def lstm_y_forward(x, params):
    T, _ = x.shape
    H = params["whh_f"].shape[0]
    K = params["wout"].shape[1]
    KP = max(128, pl.cdiv(K, 128) * 128)   # lane-dense tag width

    # Wrapper-side (XLA) packing — all static-shaped, outside the kernel.
    x_both = jnp.concatenate([x, x[::-1]], axis=1)             # (T, 2D)
    wih = _interleave_dirs(params["wih_f"], params["wih_b"])   # (2D, 8H)
    whh = _interleave_dirs(params["whh_f"], params["whh_b"])   # (2H, 8H)
    b = _interleave_bias(params["b_f"], params["b_b"])         # (1, 8H)

    # Lane-dense epilogue: pad hidden2tag to 128 output lanes (zeros), slice the
    # K real columns back out after the kernel.
    pad = KP - K
    wout_f = jnp.pad(params["wout"][:H], ((0, 0), (0, pad)))   # (H, 128)
    wout_b = jnp.pad(params["wout"][H:], ((0, 0), (0, pad)))   # (H, 128)
    bout = jnp.pad(params["bout"], ((0, 0), (0, pad)))         # (1, 128)

    out_pad = pl.pallas_call(
        functools.partial(lstm_y_kernel, K),
        out_shape=jax.ShapeDtypeStruct((T, KP), jnp.float32),
        compiler_params=pltpu.CompilerParams(
            vmem_limit_bytes=32 * 1024 * 1024),
    )(x_both, wih, b, whh, wout_f, wout_b, bout)
    return out_pad[:, :K]


def init_params(key, input_dim, hidden_dim, tagset_size):
    """Deterministic synthetic params, PyTorch-style uniform(-1/sqrt(H), 1/sqrt(H))."""
    ks = jax.random.split(key, 10)
    s = 1.0 / jnp.sqrt(hidden_dim)
    u = lambda k, shape: jax.random.uniform(k, shape, jnp.float32, -s, s)
    H, D, K = hidden_dim, input_dim, tagset_size
    return {
        # stored already transposed for x @ W, gate order i,f,g,o
        "wih_f": u(ks[0], (D, 4 * H)),
        "whh_f": u(ks[1], (H, 4 * H)),
        "b_f":   u(ks[2], (1, 4 * H)) + u(ks[3], (1, 4 * H)),  # bias_ih + bias_hh
        "wih_b": u(ks[4], (D, 4 * H)),
        "whh_b": u(ks[5], (H, 4 * H)),
        "b_b":   u(ks[6], (1, 4 * H)) + u(ks[7], (1, 4 * H)),
        "wout":  u(ks[8], (2 * H, K)),
        "bout":  u(ks[9], (1, K)),
    }


def reference_forward(x, params):
    """Plain-JAX reference mirroring torch.nn.LSTM(bidirectional) + Linear + softmax."""
    H = params["whh_f"].shape[0]

    def run_dir(xs, wih, whh, b):
        xg = xs @ wih + b

        def step(carry, xg_t):
            h, c = carry
            g = xg_t[None, :] + h @ whh
            i = jax.nn.sigmoid(g[:, 0 * H:1 * H])
            f = jax.nn.sigmoid(g[:, 1 * H:2 * H])
            gg = jnp.tanh(g[:, 2 * H:3 * H])
            o = jax.nn.sigmoid(g[:, 3 * H:4 * H])
            c = f * c + i * gg
            h = o * jnp.tanh(c)
            return (h, c), h[0]

        init = (jnp.zeros((1, H), jnp.float32), jnp.zeros((1, H), jnp.float32))
        _, hs = lax.scan(step, init, xg)
        return hs

    h_f = run_dir(x, params["wih_f"], params["whh_f"], params["b_f"])
    h_b = run_dir(x[::-1], params["wih_b"], params["whh_b"], params["b_b"])[::-1]
    hh = jnp.concatenate([h_f, h_b], axis=-1)
    tag = hh @ params["wout"] + params["bout"]
    return jax.nn.softmax(tag, axis=1)


if __name__ == "__main__":
    SEQ_LEN, INPUT_DIM, HIDDEN_DIM, TAGSET = 8, 16, 32, 8

    key = jax.random.PRNGKey(0)
    kx, kp = jax.random.split(key)
    x = jax.random.normal(kx, (SEQ_LEN, INPUT_DIM), jnp.float32)
    params = init_params(kp, INPUT_DIM, HIDDEN_DIM, TAGSET)

    out = jax.block_until_ready(lstm_y_forward(x, params))
    ref = jax.block_until_ready(reference_forward(x, params))

    assert out.shape == (SEQ_LEN, TAGSET)
    assert bool(jnp.all(jnp.isfinite(out)))
    # Exact softmax reciprocal + single-tanh gates: tolerance tightened vs. the
    # previous approx-reciprocal version (was 2e-3).
    assert bool(jnp.allclose(out, ref, atol=1e-4, rtol=1e-4))
    print("KERNEL_OK")
</pallas_src>

<mosaic_0001>
module attributes {stable_mosaic.version = 11 : i64} {
  func.func @lstm_y_kernel(%arg0: memref<8x32xf32, #tpu.memory_space<vmem>>, %arg1: memref<32x256xf32, #tpu.memory_space<vmem>>, %arg2: memref<1x256xf32, #tpu.memory_space<vmem>>, %arg3: memref<64x256xf32, #tpu.memory_space<vmem>>, %arg4: memref<32x128xf32, #tpu.memory_space<vmem>>, %arg5: memref<32x128xf32, #tpu.memory_space<vmem>>, %arg6: memref<1x128xf32, #tpu.memory_space<vmem>>, %arg7: memref<8x128xf32, #tpu.memory_space<vmem>>) attributes {dimension_semantics = [], scalar_prefetch = 0 : i64, scratch_operands = 0 : i64, tpu.core_type = #tpu.core_type<tc>} {
    %c0 = arith.constant 0 : index
    %c0_0 = arith.constant 0 : index
    %0 = vector.load %arg0[%c0, %c0_0] : memref<8x32xf32, #tpu.memory_space<vmem>>, vector<8x32xf32>
    %c0_1 = arith.constant 0 : index
    %c0_2 = arith.constant 0 : index
    %1 = vector.load %arg1[%c0_1, %c0_2] : memref<32x256xf32, #tpu.memory_space<vmem>>, vector<32x256xf32>
    %cst = arith.constant dense<0.000000e+00> : vector<8x256xf32>
    %2 = tpu.matmul %0, %1, %cst {dimension_numbers = #tpu.dot_dimension_numbers<[1], [0], [0], [1], [0, 0, 1, 1], [], []>} : vector<8x32xf32>, vector<32x256xf32>, vector<8x256xf32> -> vector<8x256xf32>
    %c0_3 = arith.constant 0 : index
    %c0_4 = arith.constant 0 : index
    %3 = vector.load %arg2[%c0_3, %c0_4] : memref<1x256xf32, #tpu.memory_space<vmem>>, vector<1x256xf32>
    %4 = vector.broadcast %3 : vector<1x256xf32> to vector<8x256xf32>
    %5 = arith.addf %2, %4 : vector<8x256xf32>
    %c0_5 = arith.constant 0 : index
    %c0_6 = arith.constant 0 : index
    %6 = vector.load %arg3[%c0_5, %c0_6] : memref<64x256xf32, #tpu.memory_space<vmem>>, vector<64x256xf32>
    %7 = tpu.iota {dimensions = array<i32: 1>} : vector<1x256xi32>
    %c128_i32 = arith.constant 128 : i32
    %8 = vector.broadcast %c128_i32 : i32 to vector<1x256xi32>
    %9 = arith.cmpi sge, %7, %8 : vector<1x256xi32>
    %c192_i32 = arith.constant 192 : i32
    %10 = vector.broadcast %c192_i32 : i32 to vector<1x256xi32>
    %11 = arith.cmpi slt, %7, %10 : vector<1x256xi32>
    %12 = arith.andi %9, %11 : vector<1x256xi1>
    %cst_7 = arith.constant 0.000000e+00 : f32
    %13 = vector.broadcast %cst_7 : f32 to vector<1x64xf32>
    %cst_8 = arith.constant 0.000000e+00 : f32
    %14 = vector.broadcast %cst_8 : f32 to vector<1x64xf32>
    %15 = vector.extract_strided_slice %5 {offsets = [0, 0], sizes = [1, 256], strides = [1, 1]} : vector<8x256xf32> to vector<1x256xf32>
    %cst_9 = arith.constant dense<0.000000e+00> : vector<1x256xf32>
    %16 = tpu.matmul %13, %6, %cst_9 {dimension_numbers = #tpu.dot_dimension_numbers<[1], [0], [0], [1], [0, 0, 1, 1], [], []>} : vector<1x64xf32>, vector<64x256xf32>, vector<1x256xf32> -> vector<1x256xf32>
    %17 = arith.addf %15, %16 : vector<1x256xf32>
    %cst_10 = arith.constant 5.000000e-01 : f32
    %18 = vector.broadcast %cst_10 : f32 to vector<1x256xf32>
    %19 = arith.mulf %18, %17 : vector<1x256xf32>
    %20 = arith.select %12, %17, %19 : vector<1x256xi1>, vector<1x256xf32>
    %21 = math.tanh %20 : vector<1x256xf32>
    %cst_11 = arith.constant 5.000000e-01 : f32
    %22 = vector.broadcast %cst_11 : f32 to vector<1x256xf32>
    %23 = arith.mulf %22, %21 : vector<1x256xf32>
    %cst_12 = arith.constant 5.000000e-01 : f32
    %24 = vector.broadcast %cst_12 : f32 to vector<1x256xf32>
    %25 = arith.addf %23, %24 : vector<1x256xf32>
    %26 = arith.select %12, %21, %25 : vector<1x256xi1>, vector<1x256xf32>
    %27 = vector.extract_strided_slice %26 {offsets = [0, 0], sizes = [1, 64], strides = [1, 1]} : vector<1x256xf32> to vector<1x64xf32>
    %28 = vector.extract_strided_slice %26 {offsets = [0, 64], sizes = [1, 64], strides = [1, 1]} : vector<1x256xf32> to vector<1x64xf32>
    %29 = vector.extract_strided_slice %26 {offsets = [0, 128], sizes = [1, 64], strides = [1, 1]} : vector<1x256xf32> to vector<1x64xf32>
    %30 = vector.extract_strided_slice %26 {offsets = [0, 192], sizes = [1, 64], strides = [1, 1]} : vector<1x256xf32> to vector<1x64xf32>
    %31 = arith.mulf %28, %14 : vector<1x64xf32>
    %32 = arith.mulf %27, %29 : vector<1x64xf32>
    %33 = arith.addf %31, %32 : vector<1x64xf32>
    %34 = math.tanh %33 : vector<1x64xf32>
    %35 = arith.mulf %30, %34 : vector<1x64xf32>
    %36 = vector.extract_strided_slice %35 {offsets = [0, 0], sizes = [1, 32], strides = [1, 1]} : vector<1x64xf32> to vector<1x32xf32>
    %37 = vector.extract_strided_slice %35 {offsets = [0, 32], sizes = [1, 32], strides = [1, 1]} : vector<1x64xf32> to vector<1x32xf32>
    %38 = vector.extract_strided_slice %5 {offsets = [1, 0], sizes = [1, 256], strides = [1, 1]} : vector<8x256xf32> to vector<1x256xf32>
    %cst_13 = arith.constant dense<0.000000e+00> : vector<1x256xf32>
    %39 = tpu.matmul %35, %6, %cst_13 {dimension_numbers = #tpu.dot_dimension_numbers<[1], [0], [0], [1], [0, 0, 1, 1], [], []>} : vector<1x64xf32>, vector<64x256xf32>, vector<1x256xf32> -> vector<1x256xf32>
    %40 = arith.addf %38, %39 : vector<1x256xf32>
    %cst_14 = arith.constant 5.000000e-01 : f32
    %41 = vector.broadcast %cst_14 : f32 to vector<1x256xf32>
    %42 = arith.mulf %41, %40 : vector<1x256xf32>
    %43 = arith.select %12, %40, %42 : vector<1x256xi1>, vector<1x256xf32>
    %44 = math.tanh %43 : vector<1x256xf32>
    %cst_15 = arith.constant 5.000000e-01 : f32
    %45 = vector.broadcast %cst_15 : f32 to vector<1x256xf32>
    %46 = arith.mulf %45, %44 : vector<1x256xf32>
    %cst_16 = arith.constant 5.000000e-01 : f32
    %47 = vector.broadcast %cst_16 : f32 to vector<1x256xf32>
    %48 = arith.addf %46, %47 : vector<1x256xf32>
    %49 = arith.select %12, %44, %48 : vector<1x256xi1>, vector<1x256xf32>
    %50 = vector.extract_strided_slice %49 {offsets = [0, 0], sizes = [1, 64], strides = [1, 1]} : vector<1x256xf32> to vector<1x64xf32>
    %51 = vector.extract_strided_slice %49 {offsets = [0, 64], sizes = [1, 64], strides = [1, 1]} : vector<1x256xf32> to vector<1x64xf32>
    %52 = vector.extract_strided_slice %49 {offsets = [0, 128], sizes = [1, 64], strides = [1, 1]} : vector<1x256xf32> to vector<1x64xf32>
    %53 = vector.extract_strided_slice %49 {offsets = [0, 192], sizes = [1, 64], strides = [1, 1]} : vector<1x256xf32> to vector<1x64xf32>
    %54 = arith.mulf %51, %33 : vector<1x64xf32>
    %55 = arith.mulf %50, %52 : vector<1x64xf32>
    %56 = arith.addf %54, %55 : vector<1x64xf32>
    %57 = math.tanh %56 : vector<1x64xf32>
    %58 = arith.mulf %53, %57 : vector<1x64xf32>
    %59 = vector.extract_strided_slice %58 {offsets = [0, 0], sizes = [1, 32], strides = [1, 1]} : vector<1x64xf32> to vector<1x32xf32>
    %60 = vector.extract_strided_slice %58 {offsets = [0, 32], sizes = [1, 32], strides = [1, 1]} : vector<1x64xf32> to vector<1x32xf32>
    %61 = vector.extract_strided_slice %5 {offsets = [2, 0], sizes = [1, 256], strides = [1, 1]} : vector<8x256xf32> to vector<1x256xf32>
    %cst_17 = arith.constant dense<0.000000e+00> : vector<1x256xf32>
    %62 = tpu.matmul %58, %6, %cst_17 {dimension_numbers = #tpu.dot_dimension_numbers<[1], [0], [0], [1], [0, 0, 1, 1], [], []>} : vector<1x64xf32>, vector<64x256xf32>, vector<1x256xf32> -> vector<1x256xf32>
    %63 = arith.addf %61, %62 : vector<1x256xf32>
    %cst_18 = arith.constant 5.000000e-01 : f32
    %64 = vector.broadcast %cst_18 : f32 to vector<1x256xf32>
    %65 = arith.mulf %64, %63 : vector<1x256xf32>
    %66 = arith.select %12, %63, %65 : vector<1x256xi1>, vector<1x256xf32>
    %67 = math.tanh %66 : vector<1x256xf32>
    %cst_19 = arith.constant 5.000000e-01 : f32
    %68 = vector.broadcast %cst_19 : f32 to vector<1x256xf32>
    %69 = arith.mulf %68, %67 : vector<1x256xf32>
    %cst_20 = arith.constant 5.000000e-01 : f32
    %70 = vector.broadcast %cst_20 : f32 to vector<1x256xf32>
    %71 = arith.addf %69, %70 : vector<1x256xf32>
    %72 = arith.select %12, %67, %71 : vector<1x256xi1>, vector<1x256xf32>
    %73 = vector.extract_strided_slice %72 {offsets = [0, 0], sizes = [1, 64], strides = [1, 1]} : vector<1x256xf32> to vector<1x64xf32>
    %74 = vector.extract_strided_slice %72 {offsets = [0, 64], sizes = [1, 64], strides = [1, 1]} : vector<1x256xf32> to vector<1x64xf32>
    %75 = vector.extract_strided_slice %72 {offsets = [0, 128], sizes = [1, 64], strides = [1, 1]} : vector<1x256xf32> to vector<1x64xf32>
    %76 = vector.extract_strided_slice %72 {offsets = [0, 192], sizes = [1, 64], strides = [1, 1]} : vector<1x256xf32> to vector<1x64xf32>
    %77 = arith.mulf %74, %56 : vector<1x64xf32>
    %78 = arith.mulf %73, %75 : vector<1x64xf32>
    %79 = arith.addf %77, %78 : vector<1x64xf32>
    %80 = math.tanh %79 : vector<1x64xf32>
    %81 = arith.mulf %76, %80 : vector<1x64xf32>
    %82 = vector.extract_strided_slice %81 {offsets = [0, 0], sizes = [1, 32], strides = [1, 1]} : vector<1x64xf32> to vector<1x32xf32>
    %83 = vector.extract_strided_slice %81 {offsets = [0, 32], sizes = [1, 32], strides = [1, 1]} : vector<1x64xf32> to vector<1x32xf32>
    %84 = vector.extract_strided_slice %5 {offsets = [3, 0], sizes = [1, 256], strides = [1, 1]} : vector<8x256xf32> to vector<1x256xf32>
    %cst_21 = arith.constant dense<0.000000e+00> : vector<1x256xf32>
    %85 = tpu.matmul %81, %6, %cst_21 {dimension_numbers = #tpu.dot_dimension_numbers<[1], [0], [0], [1], [0, 0, 1, 1], [], []>} : vector<1x64xf32>, vector<64x256xf32>, vector<1x256xf32> -> vector<1x256xf32>
    %86 = arith.addf %84, %85 : vector<1x256xf32>
    %cst_22 = arith.constant 5.000000e-01 : f32
    %87 = vector.broadcast %cst_22 : f32 to vector<1x256xf32>
    %88 = arith.mulf %87, %86 : vector<1x256xf32>
    %89 = arith.select %12, %86, %88 : vector<1x256xi1>, vector<1x256xf32>
    %90 = math.tanh %89 : vector<1x256xf32>
    %cst_23 = arith.constant 5.000000e-01 : f32
    %91 = vector.broadcast %cst_23 : f32 to vector<1x256xf32>
    %92 = arith.mulf %91, %90 : vector<1x256xf32>
    %cst_24 = arith.constant 5.000000e-01 : f32
    %93 = vector.broadcast %cst_24 : f32 to vector<1x256xf32>
    %94 = arith.addf %92, %93 : vector<1x256xf32>
    %95 = arith.select %12, %90, %94 : vector<1x256xi1>, vector<1x256xf32>
    %96 = vector.extract_strided_slice %95 {offsets = [0, 0], sizes = [1, 64], strides = [1, 1]} : vector<1x256xf32> to vector<1x64xf32>
    %97 = vector.extract_strided_slice %95 {offsets = [0, 64], sizes = [1, 64], strides = [1, 1]} : vector<1x256xf32> to vector<1x64xf32>
    %98 = vector.extract_strided_slice %95 {offsets = [0, 128], sizes = [1, 64], strides = [1, 1]} : vector<1x256xf32> to vector<1x64xf32>
    %99 = vector.extract_strided_slice %95 {offsets = [0, 192], sizes = [1, 64], strides = [1, 1]} : vector<1x256xf32> to vector<1x64xf32>
    %100 = arith.mulf %97, %79 : vector<1x64xf32>
    %101 = arith.mulf %96, %98 : vector<1x64xf32>
    %102 = arith.addf %100, %101 : vector<1x64xf32>
    %103 = math.tanh %102 : vector<1x64xf32>
    %104 = arith.mulf %99, %103 : vector<1x64xf32>
    %105 = vector.extract_strided_slice %104 {offsets = [0, 0], sizes = [1, 32], strides = [1, 1]} : vector<1x64xf32> to vector<1x32xf32>
    %106 = vector.extract_strided_slice %104 {offsets = [0, 32], sizes = [1, 32], strides = [1, 1]} : vector<1x64xf32> to vector<1x32xf32>
    %107 = vector.extract_strided_slice %5 {offsets = [4, 0], sizes = [1, 256], strides = [1, 1]} : vector<8x256xf32> to vector<1x256xf32>
    %cst_25 = arith.constant dense<0.000000e+00> : vector<1x256xf32>
    %108 = tpu.matmul %104, %6, %cst_25 {dimension_numbers = #tpu.dot_dimension_numbers<[1], [0], [0], [1], [0, 0, 1, 1], [], []>} : vector<1x64xf32>, vector<64x256xf32>, vector<1x256xf32> -> vector<1x256xf32>
    %109 = arith.addf %107, %108 : vector<1x256xf32>
    %cst_26 = arith.constant 5.000000e-01 : f32
    %110 = vector.broadcast %cst_26 : f32 to vector<1x256xf32>
    %111 = arith.mulf %110, %109 : vector<1x256xf32>
    %112 = arith.select %12, %109, %111 : vector<1x256xi1>, vector<1x256xf32>
    %113 = math.tanh %112 : vector<1x256xf32>
    %cst_27 = arith.constant 5.000000e-01 : f32
    %114 = vector.broadcast %cst_27 : f32 to vector<1x256xf32>
    %115 = arith.mulf %114, %113 : vector<1x256xf32>
    %cst_28 = arith.constant 5.000000e-01 : f32
    %116 = vector.broadcast %cst_28 : f32 to vector<1x256xf32>
    %117 = arith.addf %115, %116 : vector<1x256xf32>
    %118 = arith.select %12, %113, %117 : vector<1x256xi1>, vector<1x256xf32>
    %119 = vector.extract_strided_slice %118 {offsets = [0, 0], sizes = [1, 64], strides = [1, 1]} : vector<1x256xf32> to vector<1x64xf32>
    %120 = vector.extract_strided_slice %118 {offsets = [0, 64], sizes = [1, 64], strides = [1, 1]} : vector<1x256xf32> to vector<1x64xf32>
    %121 = vector.extract_strided_slice %118 {offsets = [0, 128], sizes = [1, 64], strides = [1, 1]} : vector<1x256xf32> to vector<1x64xf32>
    %122 = vector.extract_strided_slice %118 {offsets = [0, 192], sizes = [1, 64], strides = [1, 1]} : vector<1x256xf32> to vector<1x64xf32>
    %123 = arith.mulf %120, %102 : vector<1x64xf32>
    %124 = arith.mulf %119, %121 : vector<1x64xf32>
    %125 = arith.addf %123, %124 : vector<1x64xf32>
    %126 = math.tanh %125 : vector<1x64xf32>
    %127 = arith.mulf %122, %126 : vector<1x64xf32>
    %128 = vector.extract_strided_slice %127 {offsets = [0, 0], sizes = [1, 32], strides = [1, 1]} : vector<1x64xf32> to vector<1x32xf32>
    %129 = vector.extract_strided_slice %127 {offsets = [0, 32], sizes = [1, 32], strides = [1, 1]} : vector<1x64xf32> to vector<1x32xf32>
    %130 = vector.extract_strided_slice %5 {offsets = [5, 0], sizes = [1, 256], strides = [1, 1]} : vector<8x256xf32> to vector<1x256xf32>
    %cst_29 = arith.constant dense<0.000000e+00> : vector<1x256xf32>
    %131 = tpu.matmul %127, %6, %cst_29 {dimension_numbers = #tpu.dot_dimension_numbers<[1], [0], [0], [1], [0, 0, 1, 1], [], []>} : vector<1x64xf32>, vector<64x256xf32>, vector<1x256xf32> -> vector<1x256xf32>
    %132 = arith.addf %130, %131 : vector<1x256xf32>
    %cst_30 = arith.constant 5.000000e-01 : f32
    %133 = vector.broadcast %cst_30 : f32 to vector<1x256xf32>
    %134 = arith.mulf %133, %132 : vector<1x256xf32>
    %135 = arith.select %12, %132, %134 : vector<1x256xi1>, vector<1x256xf32>
    %136 = math.tanh %135 : vector<1x256xf32>
    %cst_31 = arith.constant 5.000000e-01 : f32
    %137 = vector.broadcast %cst_31 : f32 to vector<1x256xf32>
    %138 = arith.mulf %137, %136 : vector<1x256xf32>
    %cst_32 = arith.constant 5.000000e-01 : f32
    %139 = vector.broadcast %cst_32 : f32 to vector<1x256xf32>
    %140 = arith.addf %138, %139 : vector<1x256xf32>
    %141 = arith.select %12, %136, %140 : vector<1x256xi1>, vector<1x256xf32>
    %142 = vector.extract_strided_slice %141 {offsets = [0, 0], sizes = [1, 64], strides = [1, 1]} : vector<1x256xf32> to vector<1x64xf32>
    %143 = vector.extract_strided_slice %141 {offsets = [0, 64], sizes = [1, 64], strides = [1, 1]} : vector<1x256xf32> to vector<1x64xf32>
    %144 = vector.extract_strided_slice %141 {offsets = [0, 128], sizes = [1, 64], strides = [1, 1]} : vector<1x256xf32> to vector<1x64xf32>
    %145 = vector.extract_strided_slice %141 {offsets = [0, 192], sizes = [1, 64], strides = [1, 1]} : vector<1x256xf32> to vector<1x64xf32>
    %146 = arith.mulf %143, %125 : vector<1x64xf32>
    %147 = arith.mulf %142, %144 : vector<1x64xf32>
    %148 = arith.addf %146, %147 : vector<1x64xf32>
    %149 = math.tanh %148 : vector<1x64xf32>
    %150 = arith.mulf %145, %149 : vector<1x64xf32>
    %151 = vector.extract_strided_slice %150 {offsets = [0, 0], sizes = [1, 32], strides = [1, 1]} : vector<1x64xf32> to vector<1x32xf32>
    %152 = vector.extract_strided_slice %150 {offsets = [0, 32], sizes = [1, 32], strides = [1, 1]} : vector<1x64xf32> to vector<1x32xf32>
    %153 = vector.extract_strided_slice %5 {offsets = [6, 0], sizes = [1, 256], strides = [1, 1]} : vector<8x256xf32> to vector<1x256xf32>
    %cst_33 = arith.constant dense<0.000000e+00> : vector<1x256xf32>
    %154 = tpu.matmul %150, %6, %cst_33 {dimension_numbers = #tpu.dot_dimension_numbers<[1], [0], [0], [1], [0, 0, 1, 1], [], []>} : vector<1x64xf32>, vector<64x256xf32>, vector<1x256xf32> -> vector<1x256xf32>
    %155 = arith.addf %153, %154 : vector<1x256xf32>
    %cst_34 = arith.constant 5.000000e-01 : f32
    %156 = vector.broadcast %cst_34 : f32 to vector<1x256xf32>
    %157 = arith.mulf %156, %155 : vector<1x256xf32>
    %158 = arith.select %12, %155, %157 : vector<1x256xi1>, vector<1x256xf32>
    %159 = math.tanh %158 : vector<1x256xf32>
    %cst_35 = arith.constant 5.000000e-01 : f32
    %160 = vector.broadcast %cst_35 : f32 to vector<1x256xf32>
    %161 = arith.mulf %160, %159 : vector<1x256xf32>
    %cst_36 = arith.constant 5.000000e-01 : f32
    %162 = vector.broadcast %cst_36 : f32 to vector<1x256xf32>
    %163 = arith.addf %161, %162 : vector<1x256xf32>
    %164 = arith.select %12, %159, %163 : vector<1x256xi1>, vector<1x256xf32>
    %165 = vector.extract_strided_slice %164 {offsets = [0, 0], sizes = [1, 64], strides = [1, 1]} : vector<1x256xf32> to vector<1x64xf32>
    %166 = vector.extract_strided_slice %164 {offsets = [0, 64], sizes = [1, 64], strides = [1, 1]} : vector<1x256xf32> to vector<1x64xf32>
    %167 = vector.extract_strided_slice %164 {offsets = [0, 128], sizes = [1, 64], strides = [1, 1]} : vector<1x256xf32> to vector<1x64xf32>
    %168 = vector.extract_strided_slice %164 {offsets = [0, 192], sizes = [1, 64], strides = [1, 1]} : vector<1x256xf32> to vector<1x64xf32>
    %169 = arith.mulf %166, %148 : vector<1x64xf32>
    %170 = arith.mulf %165, %167 : vector<1x64xf32>
    %171 = arith.addf %169, %170 : vector<1x64xf32>
    %172 = math.tanh %171 : vector<1x64xf32>
    %173 = arith.mulf %168, %172 : vector<1x64xf32>
    %174 = vector.extract_strided_slice %173 {offsets = [0, 0], sizes = [1, 32], strides = [1, 1]} : vector<1x64xf32> to vector<1x32xf32>
    %175 = vector.extract_strided_slice %173 {offsets = [0, 32], sizes = [1, 32], strides = [1, 1]} : vector<1x64xf32> to vector<1x32xf32>
    %176 = vector.extract_strided_slice %5 {offsets = [7, 0], sizes = [1, 256], strides = [1, 1]} : vector<8x256xf32> to vector<1x256xf32>
    %cst_37 = arith.constant dense<0.000000e+00> : vector<1x256xf32>
    %177 = tpu.matmul %173, %6, %cst_37 {dimension_numbers = #tpu.dot_dimension_numbers<[1], [0], [0], [1], [0, 0, 1, 1], [], []>} : vector<1x64xf32>, vector<64x256xf32>, vector<1x256xf32> -> vector<1x256xf32>
    %178 = arith.addf %176, %177 : vector<1x256xf32>
    %cst_38 = arith.constant 5.000000e-01 : f32
    %179 = vector.broadcast %cst_38 : f32 to vector<1x256xf32>
    %180 = arith.mulf %179, %178 : vector<1x256xf32>
    %181 = arith.select %12, %178, %180 : vector<1x256xi1>, vector<1x256xf32>
    %182 = math.tanh %181 : vector<1x256xf32>
    %cst_39 = arith.constant 5.000000e-01 : f32
    %183 = vector.broadcast %cst_39 : f32 to vector<1x256xf32>
    %184 = arith.mulf %183, %182 : vector<1x256xf32>
    %cst_40 = arith.constant 5.000000e-01 : f32
    %185 = vector.broadcast %cst_40 : f32 to vector<1x256xf32>
    %186 = arith.addf %184, %185 : vector<1x256xf32>
    %187 = arith.select %12, %182, %186 : vector<1x256xi1>, vector<1x256xf32>
    %188 = vector.extract_strided_slice %187 {offsets = [0, 0], sizes = [1, 64], strides = [1, 1]} : vector<1x256xf32> to vector<1x64xf32>
    %189 = vector.extract_strided_slice %187 {offsets = [0, 64], sizes = [1, 64], strides = [1, 1]} : vector<1x256xf32> to vector<1x64xf32>
    %190 = vector.extract_strided_slice %187 {offsets = [0, 128], sizes = [1, 64], strides = [1, 1]} : vector<1x256xf32> to vector<1x64xf32>
    %191 = vector.extract_strided_slice %187 {offsets = [0, 192], sizes = [1, 64], strides = [1, 1]} : vector<1x256xf32> to vector<1x64xf32>
    %192 = arith.mulf %189, %171 : vector<1x64xf32>
    %193 = arith.mulf %188, %190 : vector<1x64xf32>
    %194 = arith.addf %192, %193 : vector<1x64xf32>
    %195 = math.tanh %194 : vector<1x64xf32>
    %196 = arith.mulf %191, %195 : vector<1x64xf32>
    %197 = vector.extract_strided_slice %196 {offsets = [0, 0], sizes = [1, 32], strides = [1, 1]} : vector<1x64xf32> to vector<1x32xf32>
    %198 = vector.extract_strided_slice %196 {offsets = [0, 32], sizes = [1, 32], strides = [1, 1]} : vector<1x64xf32> to vector<1x32xf32>
    %199 = tpu.concatenate %36, %59, %82, %105, %128, %151, %174, %197 in 0 : vector<1x32xf32>, vector<1x32xf32>, vector<1x32xf32>, vector<1x32xf32>, vector<1x32xf32>, vector<1x32xf32>, vector<1x32xf32>, vector<1x32xf32> -> vector<8x32xf32>
    %200 = tpu.concatenate %198, %175, %152, %129, %106, %83, %60, %37 in 0 : vector<1x32xf32>, vector<1x32xf32>, vector<1x32xf32>, vector<1x32xf32>, vector<1x32xf32>, vector<1x32xf32>, vector<1x32xf32>, vector<1x32xf32> -> vector<8x32xf32>
    %c0_41 = arith.constant 0 : index
    %c0_42 = arith.constant 0 : index
    %201 = vector.load %arg4[%c0_41, %c0_42] : memref<32x128xf32, #tpu.memory_space<vmem>>, vector<32x128xf32>
    %cst_43 = arith.constant dense<0.000000e+00> : vector<8x128xf32>
    %202 = tpu.matmul %199, %201, %cst_43 {dimension_numbers = #tpu.dot_dimension_numbers<[1], [0], [0], [1], [0, 0, 1, 1], [], []>} : vector<8x32xf32>, vector<32x128xf32>, vector<8x128xf32> -> vector<8x128xf32>
    %c0_44 = arith.constant 0 : index
    %c0_45 = arith.constant 0 : index
    %203 = vector.load %arg5[%c0_44, %c0_45] : memref<32x128xf32, #tpu.memory_space<vmem>>, vector<32x128xf32>
    %cst_46 = arith.constant dense<0.000000e+00> : vector<8x128xf32>
    %204 = tpu.matmul %200, %203, %cst_46 {dimension_numbers = #tpu.dot_dimension_numbers<[1], [0], [0], [1], [0, 0, 1, 1], [], []>} : vector<8x32xf32>, vector<32x128xf32>, vector<8x128xf32> -> vector<8x128xf32>
    %205 = arith.addf %202, %204 : vector<8x128xf32>
    %c0_47 = arith.constant 0 : index
    %c0_48 = arith.constant 0 : index
    %206 = vector.load %arg6[%c0_47, %c0_48] : memref<1x128xf32, #tpu.memory_space<vmem>>, vector<1x128xf32>
    %207 = vector.broadcast %206 : vector<1x128xf32> to vector<8x128xf32>
    %208 = arith.addf %205, %207 : vector<8x128xf32>
    %209 = tpu.iota {dimensions = array<i32: 1>} : vector<1x128xi32>
    %c8_i32 = arith.constant 8 : i32
    %210 = vector.broadcast %c8_i32 : i32 to vector<1x128xi32>
    %211 = arith.cmpi slt, %209, %210 : vector<1x128xi32>
    %cst_49 = arith.constant -1.000000e+30 : f32
    %212 = vector.shape_cast %211 : vector<1x128xi1> to vector<1x128xi1>
    %213 = vector.broadcast %212 : vector<1x128xi1> to vector<8x128xi1>
    %214 = vector.broadcast %cst_49 : f32 to vector<8x128xf32>
    %215 = arith.select %213, %208, %214 : vector<8x128xi1>, vector<8x128xf32>
    %cst_50 = arith.constant dense<0xFF800000> : vector<8xf32>
    %216 = vector.multi_reduction <maximumf>, %215, %cst_50 [1] : vector<8x128xf32> to vector<8xf32>
    %217 = vector.shape_cast %216 : vector<8xf32> to vector<8x1xf32>
    %218 = vector.broadcast %217 : vector<8x1xf32> to vector<8x128xf32>
    %219 = arith.subf %215, %218 : vector<8x128xf32>
    %220 = math.exp %219 : vector<8x128xf32>
    %cst_51 = arith.constant dense<0.000000e+00> : vector<8xf32>
    %221 = vector.multi_reduction <add>, %220, %cst_51 [1] : vector<8x128xf32> to vector<8xf32>
    %222 = vector.shape_cast %221 : vector<8xf32> to vector<8x1xf32>
    %223 = tpu.reciprocal %222 : vector<8x1xf32> -> vector<8x1xf32>
    %224 = vector.broadcast %223 : vector<8x1xf32> to vector<8x128xf32>
    %225 = arith.mulf %220, %224 : vector<8x128xf32>
    %c0_52 = arith.constant 0 : index
    %c0_53 = arith.constant 0 : index
    %226 = vector.load %arg7[%c0_52, %c0_53] : memref<8x128xf32, #tpu.memory_space<vmem>>, vector<8x128xf32>
    tpu.vector_store %arg7[%c0_52, %c0_53], %225 {strides = array<i32>} : memref<8x128xf32, #tpu.memory_space<vmem>>, vector<8x128xf32>,
    return
  }
}

</mosaic_0001>

<bundles_post_ra>
// kernel: tpu_custom_call.1
= control target key start
LH: loop header
LB: loop body
LE: loop exit
PB: predicated region body
PF: predicated region fallthrough
CT: control target
= control target key end

     0   :  { %12 = vsyncpa [#allocation3], 0  ;;  %s1599_s0 = inlined_call_operand.hbm [shape: f32[8,32], index: 0, kind: input, shape index: {}]   ;;  %s1600_s1 = inlined_call_operand.hbm [shape: f32[32,256], index: 1, kind: input, shape index: {}]   ;;  %s1601_s2 = inlined_call_operand.hbm [shape: f32[1,256], index: 2, kind: input, shape index: {}]   ;;  %s1602_s3 = inlined_call_operand.hbm [shape: f32[64,256], index: 3, kind: input, shape index: {}]   ;;  %s1603_s4 = inlined_call_operand.hbm [shape: f32[32,128], index: 4, kind: input, shape index: {}]   ;;  %s1604_s5 = inlined_call_operand.hbm [shape: f32[32,128], index: 5, kind: input, shape index: {}]   ;;  %s1605_s6 = inlined_call_operand.vmem [shape: f32[1,128], index: 6, kind: input, shape index: {}]   ;;  %s1606_s7 = inlined_call_operand.hbm [shape: f32[8,128], index: 7, kind: output, shape index: {}]  }
   0x1   :  { %13 = vsyncpa [#allocation6], 0 }
   0x2   :  { %14 = vsyncpa [#allocation9], 0 }
   0x3   :  { %15 = vsyncpa [#allocation12], 0  ;;  %s32_s26 = sshll.u32 %s1600_s1, 4  ;;  %s33_s26 = int_to_ptr.hbm [resolvable:$true] %s32_s26 }
   0x4   :  { %16 = vsyncpa [#allocation4], 0  ;;  %s1224_s27 = smov [#allocation5]   ;;  %s56_s8 = sshll.u32 %s1602_s3, 4  ;;  %s57_s8 = int_to_ptr.hbm [resolvable:$true] %s56_s8 }
   0x5   :  { %s34_s28 = sshll.u32 %s1224_s27, 4  ;;  %s1225_s9 = smov 256   ;;  %s35_s28 = int_to_ptr.vmem [resolvable:$true] %s34_s28 }
   0x6   :  { %s1226_s10 = smov 16   ;;  %s1227_s11 = smov [#allocation8]  }
   0x7   :  { %40 = dma.hbm_to_vmem [thread:$0]  %s33_s26, 1024, %s35_s28, [#allocation6], %s1225_s9, %s1225_s9, %s1226_s10  }
   0x8   :  { %s58_s12 = sshll.u32 %s1227_s11, 4  ;;  %s22_s15 = sshll.u32 %s1599_s0, 4  ;;  %s59_s12 = int_to_ptr.vmem [resolvable:$true] %s58_s12  ;;  %s23_s15 = int_to_ptr.hbm [resolvable:$true] %s22_s15 }
   0x9   :  { %64 = dma.hbm_to_vmem [thread:$0]  %s57_s8, 2048, %s59_s12, [#allocation9], %s1225_s9, %s1225_s9, %s1226_s10  }
   0xa   :  { %s46_s17 = sshll.u32 %s1601_s2, 4  ;;  %s1228_s18 = smov [#allocation2]   ;;  %s47_s17 = int_to_ptr.hbm [resolvable:$true] %s46_s17 }
   0xb   :  { %s24_s19 = sshll.u32 %s1228_s18, 4  ;;  %s1229_s3 = smov [#allocation7]   ;;  %s25_s19 = int_to_ptr.vmem [resolvable:$true] %s24_s19 }
   0xc   :  { %27 = dma.hbm_to_vmem [thread:$0]  %s23_s15, 128, %s25_s19, [#allocation3]  }
   0xd   :  { %s48_s20 = sshll.u32 %s1229_s3, 4  ;;  %s69_s23 = sshll.u32 %s1603_s4, 4  ;;  %s49_s20 = int_to_ptr.vmem [resolvable:$true] %s48_s20  ;;  %s70_s23 = int_to_ptr.hbm [resolvable:$true] %s69_s23 }
   0xe   :  { %51 = dma.hbm_to_vmem [thread:$0]  %s47_s17, 32, %s49_s20, [#allocation6]  }
   0xf   :  { %s1230_s0 = smov [#allocation10]   ;;  %s82_s2 = sshll.u32 %s1604_s5, 4  ;;  %s83_s2 = int_to_ptr.hbm [resolvable:$true] %s82_s2 }
  0x10   :  { %s71_s24 = sshll.u32 %s1230_s0, 4  ;;  %s1231_s27 = smov 128   ;;  %s72_s24 = int_to_ptr.vmem [resolvable:$true] %s71_s24 }
  0x11   :  { %s1232_s28 = smov 8   ;;  %s1233_s29 = smov [#allocation11]  }
  0x12   :  { %77 = dma.hbm_to_vmem [thread:$0]  %s70_s23, 512, %s72_s24, [#allocation9], %s1231_s27, %s1231_s27, %s1232_s28  }
  0x13   :  { %s84_s30 = sshll.u32 %s1233_s29, 4  ;;  %s85_s30 = int_to_ptr.vmem [resolvable:$true] %s84_s30 }
  0x14   :  { %90 = dma.hbm_to_vmem [thread:$0]  %s83_s2, 512, %s85_s30, [#allocation12], %s1231_s27, %s1231_s27, %s1232_s28  }
  0x15   :  { %1214 = dma.done.wait [#allocation3], 128  }
  0x16   :  { %1215 = vsyncadd [#allocation3], 4294967168 }
  0x17   :  { %1216 = dma.done.wait [#allocation6], 1056  }
  0x18   :  { %1217 = vsyncadd [#allocation6], 4294966240 }
  0x19   :  { %1218 = dma.done.wait [#allocation9], 2560  }
  0x1a   :  { %1219 = vsyncadd [#allocation9], 4294964736 }
  0x1b   :  { %1220 = dma.done.wait [#allocation12], 512  }
  0x1c   :  { %1221 = vsyncadd [#allocation12], 4294966784  ;;  %v1296_v0 = vld [vmem:[#allocation8 + $0x78] sm:$0xff]  ;;  %v1298_v1 = vld [vmem:[#allocation8 + $0x70] sm:$0xff]  ;;  %vm132_vm0 = vcmask 261120   ;;  %v1234_v25 = vmov 0.0   ;;  %v192_v27 = vlaneseq }
  0x1d   :  { %v1300_v2 = vld [vmem:[#allocation8 + $0x68] sm:$0xff]  ;;  %233 = vmatpush.msra.mxu3 %v1296_v0  ;;  %213 = vmatpush.msra.mxu2 %v1298_v1  ;;  %v1304_v3 = vld [vmem:[#allocation8 + $0x60] sm:$0xff]  ;;  %v1306_v4 = vld [vmem:[#allocation8 + $0x58] sm:$0xff]  ;;  %s1235_s4 = smov 64   ;;  %vm201_vm2 = vcmask 523264   ;;  %vm813_vm3 = vcmask 1040384  }
  0x1e   :  { %v1308_v5 = vld [vmem:[#allocation8 + $0x50] sm:$0xff]  ;;  %v1312_v7 = vld [vmem:[#allocation8 + $0x48] sm:$0xff]  ;;  %v1314_v8 = vld [vmem:[#allocation8 + $0x40] sm:$0xff]  ;;  %v1410_v32 = vand.u32 127, %v192_v27  ;;  %vm815_vm4 = vcmask 1041408   ;;  %vm817_vm5 = vcmask 1042432  }
  0x1f   :  { %234 = vmatpush.msra.mxu3 %v1300_v2  ;;  %214 = vmatpush.msra.mxu2 %v1304_v3  ;;  %v125_v6 = vld [vmem:[#allocation5 + $0x38] sm:$0xff]  ;;  %v124_v9 = vld [vmem:[#allocation5 + $0x30] sm:$0xff]  ;;  %v123_v11 = vld [vmem:[#allocation5 + $0x28] sm:$0xff]  ;;  %vm819_vm6 = vcmask 1043456   ;;  %vm821_vm7 = vcmask 1044480   ;;  %vm823_vm8 = vcmask 1045504  }
  0x20   :  { %168 = vmatpush.msra.mxu1 %v125_v6  ;;  %v1318_v10 = vld [vmem:[#allocation8 + $0x38] sm:$0xff]  ;;  %v1320_v12 = vld [vmem:[#allocation8 + $0x30] sm:$0xff]  ;;  %148 = vmatpush.msra.mxu0 %v124_v9  ;;  %v119_v16 = vld [vmem:[#allocation5 + $0x8] sm:$0xff]  ;;  %v1417_v35 = vadd.s32 128, %v1410_v32  ;;  %vm825_vm9 = vcmask 1046528   ;;  %s1236_s5 = smov 32  }
  0x21   :  { %235 = vmatpush.msra.mxu3 %v1306_v4  ;;  %215 = vmatpush.msra.mxu2 %v1308_v5  ;;  %v122_v13 = vld [vmem:[#allocation5 + $0x20] sm:$0xff]  ;;  %v121_v14 = vld [vmem:[#allocation5 + $0x18] sm:$0xff]  ;;  %v120_v15 = vld [vmem:[#allocation5 + $0x10] sm:$0xff]  ;;  %vm914_vm10 = vcmp.lt.s32.totalorder %v1410_v32, 8  ;;  %s948_s13 = sshll.u32 %s1606_s7, 4  ;;  %s949_s13 = int_to_ptr.hbm [resolvable:$true] %s948_s13 }
  0x22   :  { %169 = vmatpush.msra.mxu1 %v123_v11  ;;  %v1324_v17 = vld [vmem:[#allocation8 + $0x28] sm:$0xff]  ;;  %v1326_v18 = vld [vmem:[#allocation8 + $0x20] sm:$0xff]  ;;  %149 = vmatpush.msra.mxu0 %v122_v13  ;;  %v117_v19 = vld [vmem:[#allocation2] sm:$0xff]  ;;  %vm198_vm1 = vcmp.lt.s32.totalorder %v1417_v35, 192 }
  0x23   :  { %236 = vmatpush.msra.mxu3 %v1312_v7  ;;  %216 = vmatpush.msra.mxu2 %v1314_v8  ;;  %v118_v20 = vld [vmem:[#allocation5] sm:$0xff]  ;;  %v1332_v22 = vld [vmem:[#allocation8 + $0x10] sm:$0xff]  ;;  %v1336_v23 = vld [vmem:[#allocation8 + $0x8] sm:$0xff] }
  0x24   :  { %170 = vmatpush.msra.mxu1 %v121_v14  ;;  %v1330_v21 = vld [vmem:[#allocation8 + $0x18] sm:$0xff]  ;;  %150 = vmatpush.msra.mxu0 %v120_v15  ;;  %v1338_v24 = vld [vmem:[#allocation8] sm:$0xff] }
  0x25   :  { %237 = vmatpush.msra.mxu3 %v1318_v10  ;;  %217 = vmatpush.msra.mxu2 %v1320_v12  ;;  %v126_v26 = vld [vmem:[#allocation7] sm:$0x3] }
  0x26   :  { %171 = vmatpush.msra.mxu1 %v119_v16  ;;  %151 = vmatpush.msra.mxu0 %v118_v20  ;;  %v129_v28 = vperm.slane %v126_v26, 1  ;;  %v128_v29 = vperm.slane %v126_v26, 0 }
  0x27   :  { %238 = vmatpush.msra.mxu3 %v1324_v17  ;;  %218 = vmatpush.msra.mxu2 %v1326_v18 }
  0x28   :  { %962 = vmatmul.msk.f32.vlgmr.msra.gmra.mxu1 %vm132_vm0, %v117_v19  ;;  %961 = vmatmul.msk.f32.vlgmr.msra.gmra.mxu0 %vm132_vm0, %v117_v19 }
  0x29   :  { %239 = vmatpush.msra.mxu3 %v1330_v21  ;;  %219 = vmatpush.msra.mxu2 %v1332_v22 }
  0x2a   :  { %301 = vmatpush.msrb.mxu1 %v1296_v0  ;;  %281 = vmatpush.msrb.mxu0 %v1298_v1 }
  0x2b   :  { %240 = vmatpush.msra.mxu3 %v1336_v23  ;;  %220 = vmatpush.msra.mxu2 %v1338_v24 }
  0x2c   :  { %241 = vmatmul.f32.vlgmr.msra.gmra.mxu3 %v1234_v25  ;;  %221 = vmatmul.f32.vlgmr.msra.gmra.mxu2 %v1234_v25 }
  0x2d   :  { %302 = vmatpush.msrb.mxu1 %v1300_v2  ;;  %359 = vmatpush.msrb.mxu2 %v1298_v1 }
  0x2e   :  { %379 = vmatpush.msrb.mxu3 %v1296_v0  ;;  %282 = vmatpush.msrb.mxu0 %v1304_v3 }
  0x2f   :  { %303 = vmatpush.msrb.mxu1 %v1306_v4  ;;  %360 = vmatpush.msrb.mxu2 %v1304_v3 }
  0x30   :  { %380 = vmatpush.msrb.mxu3 %v1300_v2  ;;  %283 = vmatpush.msrb.mxu0 %v1308_v5 }
  0x31   :  { %304 = vmatpush.msrb.mxu1 %v1312_v7  ;;  %361 = vmatpush.msrb.mxu2 %v1308_v5 }
  0x32   :  { %381 = vmatpush.msrb.mxu3 %v1306_v4  ;;  %284 = vmatpush.msrb.mxu0 %v1314_v8 }
  0x33   :  { %305 = vmatpush.msrb.mxu1 %v1318_v10  ;;  %362 = vmatpush.msrb.mxu2 %v1314_v8 }
  0x34   :  { %382 = vmatpush.msrb.mxu3 %v1312_v7  ;;  %285 = vmatpush.msrb.mxu0 %v1320_v12 }
  0x35   :  { %306 = vmatpush.msrb.mxu1 %v1324_v17  ;;  %363 = vmatpush.msrb.mxu2 %v1320_v12 }
  0x36   :  { %383 = vmatpush.msrb.mxu3 %v1318_v10  ;;  %286 = vmatpush.msrb.mxu0 %v1326_v18 }
  0x37   :  { %307 = vmatpush.msrb.mxu1 %v1330_v21  ;;  %364 = vmatpush.msrb.mxu2 %v1326_v18 }
  0x38   :  { %384 = vmatpush.msrb.mxu3 %v1324_v17  ;;  %287 = vmatpush.msrb.mxu0 %v1332_v22 }
  0x39   :  { %308 = vmatpush.msrb.mxu1 %v1336_v23  ;;  %365 = vmatpush.msrb.mxu2 %v1332_v22 }
  0x3a   :  { %385 = vmatpush.msrb.mxu3 %v1330_v21  ;;  %288 = vmatpush.msrb.mxu0 %v1338_v24 }
  0x3b   :  { %457 = vmatpush.msra.mxu1 %v1296_v0  ;;  %366 = vmatpush.msrb.mxu2 %v1338_v24 }
  0x3c   :  { %386 = vmatpush.msrb.mxu3 %v1336_v23  ;;  %437 = vmatpush.msra.mxu0 %v1298_v1 }
  0x3d   :  { %458 = vmatpush.msra.mxu1 %v1300_v2  ;;  %515 = vmatpush.msra.mxu2 %v1298_v1 }
  0x3e   :  { %535 = vmatpush.msra.mxu3 %v1296_v0  ;;  %438 = vmatpush.msra.mxu0 %v1304_v3 }
  0x3f   :  { %459 = vmatpush.msra.mxu1 %v1306_v4  ;;  %516 = vmatpush.msra.mxu2 %v1304_v3 }
  0x40   :  { %536 = vmatpush.msra.mxu3 %v1300_v2  ;;  %439 = vmatpush.msra.mxu0 %v1308_v5 }
  0x41   :  { %460 = vmatpush.msra.mxu1 %v1312_v7  ;;  %517 = vmatpush.msra.mxu2 %v1308_v5 }
  0x42   :  { %537 = vmatpush.msra.mxu3 %v1306_v4  ;;  %440 = vmatpush.msra.mxu0 %v1314_v8 }
  0x43   :  { %461 = vmatpush.msra.mxu1 %v1318_v10  ;;  %518 = vmatpush.msra.mxu2 %v1314_v8 }
  0x44   :  { %538 = vmatpush.msra.mxu3 %v1312_v7  ;;  %441 = vmatpush.msra.mxu0 %v1320_v12 }
  0x45   :  { %462 = vmatpush.msra.mxu1 %v1324_v17  ;;  %519 = vmatpush.msra.mxu2 %v1320_v12 }
  0x46   :  { %539 = vmatpush.msra.mxu3 %v1318_v10  ;;  %442 = vmatpush.msra.mxu0 %v1326_v18 }
  0x47   :  { %463 = vmatpush.msra.mxu1 %v1330_v21  ;;  %520 = vmatpush.msra.mxu2 %v1326_v18 }
  0x48   :  { %540 = vmatpush.msra.mxu3 %v1324_v17  ;;  %443 = vmatpush.msra.mxu0 %v1332_v22 }
  0x49   :  { %464 = vmatpush.msra.mxu1 %v1336_v23  ;;  %521 = vmatpush.msra.mxu2 %v1332_v22 }
  0x4a   :  { %541 = vmatpush.msra.mxu3 %v1330_v21  ;;  %444 = vmatpush.msra.mxu0 %v1338_v24 }
  0x4b   :  { %522 = vmatpush.msra.mxu2 %v1338_v24 }
  0x4c   :  { %542 = vmatpush.msra.mxu3 %v1336_v23 }
  0xa5   :  { %v173_v30 = vpop.f32.mrf.mxu1  ;;  %v153_v31 = vpop.f32.mrf.mxu0 }
  0xa6   :  { %v1412_v33 = vadd.f32 %v173_v30, %v129_v28  ;;  %v1414_v34 = vadd.f32 %v153_v31, %v128_v29 }
  0xaf   :  { %v242_v36 = vpop.f32.mrf.mxu3  ;;  %v222_v37 = vpop.f32.mrf.mxu2 }
  0xb0   :  { %v246_v38 = vadd.f32 %v242_v36, %v1412_v33  ;;  %v245_v39 = vadd.f32 %v222_v37, %v1414_v34 }
  0xb2   :  { %v248_v40 = vmul.f32 0.5, %v246_v38  ;;  %v247_v41 = vmul.f32 0.5, %v245_v39 }
  0xb4   :  { %v250_v42 = vsel %vm198_vm1, %v246_v38, %v248_v40  ;;  %994 = vtanh.f32 %v247_v41 }
  0xb5   :  { %996 = vtanh.f32 %v250_v42 }
  0xba   :  { %v995_v43 = vpop.eup %994 }
  0xbb   :  { %v997_v44 = vpop.eup %996  ;;  %v253_v45 = vmul.f32 0.5, %v995_v43 }
  0xbc   :  { %v254_v46 = vmul.f32 0.5, %v997_v44 }
  0xbd   :  { %v255_v47 = vadd.f32 0.5, %v253_v45 }
  0xbe   :  { %v256_v48 = vadd.f32 0.5, %v254_v46 }
  0xbf   :  { %v259_v51 = vmul.f32 0.0, %v255_v47 }
  0xc0   :  { %v258_v49 = vsel %vm198_vm1, %v997_v44, %v256_v48 }
  0xc1   :  { %v260_v50 = vmul.f32 %v258_v49, %v255_v47 }
  0xc3   :  { %262 = vrot.lane.b32.xlu0 %v260_v50, %s1235_s4 }
 0x135   :  { %v263_v52 = vpop.permute.xlu0 %262 }
 0x136   :  { %v265_v53 = vadd.f32 %v263_v52, %v259_v51 }
 0x138   :  { %998 = vtanh.f32 %v265_v53  ;;  %v334_v16 = vrot.slane %v265_v53, 7 }
 0x13e   :  { %v999_v54 = vpop.eup %998 }
 0x13f   :  { %v1427_v55 = vmul.f32 %v999_v54, %v258_v49 }
 0x141   :  { %269 = vrot.lane.b32.xlu0 %v1427_v55, %s1235_s4 }
 0x1b3   :  { %v270_v56 = vpop.permute.xlu0 %269 }
 0x1b4   :  { %963 = vmatmul.msk.f32.vlgmr.msrb.gmra.mxu0 %vm201_vm2, %v270_v56  ;;  %964 = vmatmul.msk.f32.vlgmr.msrb.gmra.mxu1 %vm201_vm2, %v270_v56 }
 0x1b5   :  { %593 = vmatpush.msrb.mxu0 %v1298_v1  ;;  %613 = vmatpush.msrb.mxu1 %v1296_v0 }
 0x1b7   :  { %594 = vmatpush.msrb.mxu0 %v1304_v3  ;;  %614 = vmatpush.msrb.mxu1 %v1300_v2 }
 0x1b9   :  { %595 = vmatpush.msrb.mxu0 %v1308_v5  ;;  %615 = vmatpush.msrb.mxu1 %v1306_v4 }
 0x1bb   :  { %596 = vmatpush.msrb.mxu0 %v1314_v8  ;;  %616 = vmatpush.msrb.mxu1 %v1312_v7 }
 0x1bd   :  { %597 = vmatpush.msrb.mxu0 %v1320_v12  ;;  %617 = vmatpush.msrb.mxu1 %v1318_v10 }
 0x1bf   :  { %598 = vmatpush.msrb.mxu0 %v1326_v18  ;;  %618 = vmatpush.msrb.mxu1 %v1324_v17 }
 0x1c1   :  { %599 = vmatpush.msrb.mxu0 %v1332_v22  ;;  %619 = vmatpush.msrb.mxu1 %v1330_v21 }
 0x1c3   :  { %600 = vmatpush.msrb.mxu0 %v1338_v24  ;;  %620 = vmatpush.msrb.mxu1 %v1336_v23 }
 0x231   :  { %v290_v57 = vpop.f32.mrf.mxu0  ;;  %v310_v58 = vpop.f32.mrf.mxu1 }
 0x232   :  { %v315_v59 = vrot.slane %v290_v57, 7  ;;  %v316_v60 = vrot.slane %v310_v58, 7 }
 0x234   :  { %v319_v61 = vadd.f32 %v315_v59, %v1414_v34  ;;  %v320_v62 = vadd.f32 %v316_v60, %v1412_v33 }
 0x236   :  { %v321_v63 = vmul.f32 0.5, %v319_v61  ;;  %v322_v6 = vmul.f32 0.5, %v320_v62 }
 0x238   :  { %1000 = vtanh.f32 %v321_v63  ;;  %v324_v9 = vsel %vm198_vm1, %v320_v62, %v322_v6 }
 0x239   :  { %1002 = vtanh.f32 %v324_v9 }
 0x23e   :  { %v1001_v11 = vpop.eup %1000 }
 0x23f   :  { %v1003_v13 = vpop.eup %1002  ;;  %v327_v14 = vmul.f32 0.5, %v1001_v11 }
 0x240   :  { %v328_v15 = vmul.f32 0.5, %v1003_v13 }
 0x241   :  { %v329_v19 = vadd.f32 0.5, %v327_v14 }
 0x242   :  { %v330_v20 = vadd.f32 0.5, %v328_v15 }
 0x243   :  { %v336_v25 = vmul.f32 %v334_v16, %v329_v19 }
 0x244   :  { %v332_v26 = vsel %vm198_vm1, %v1003_v13, %v330_v20 }
 0x245   :  { %v337_v27 = vmul.f32 %v332_v26, %v329_v19 }
 0x247   :  { %339 = vrot.lane.b32.xlu1 %v337_v27, %s1235_s4 }
 0x2b9   :  { %v340_v28 = vpop.permute.xlu1 %339 }
 0x2ba   :  { %v342_v29 = vadd.f32 %v340_v28, %v336_v25 }
 0x2bc   :  { %1004 = vtanh.f32 %v342_v29  ;;  %v412_v51 = vrot.slane %v342_v29, 7 }
 0x2c2   :  { %v1005_v30 = vpop.eup %1004 }
 0x2c3   :  { %v1456_v31 = vmul.f32 %v1005_v30, %v332_v26 }
 0x2c5   :  { %v346_v36 = vrot.slane %v1456_v31, 1  ;;  %v814_v62 = vsel %vm813_vm3, %v1427_v55, %v1456_v31 }
 0x2c7   :  { %347 = vrot.lane.b32.xlu1 %v346_v36, %s1235_s4 }
 0x339   :  { %v348_v37 = vpop.permute.xlu1 %347 }
 0x33a   :  { %965 = vmatmul.msk.f32.vlgmr.msrb.gmra.mxu2 %vm201_vm2, %v348_v37  ;;  %966 = vmatmul.msk.f32.vlgmr.msrb.gmra.mxu3 %vm201_vm2, %v348_v37 }
 0x33b   :  { %671 = vmatpush.msrb.mxu2 %v1298_v1  ;;  %691 = vmatpush.msrb.mxu3 %v1296_v0 }
 0x33d   :  { %672 = vmatpush.msrb.mxu2 %v1304_v3  ;;  %692 = vmatpush.msrb.mxu3 %v1300_v2 }
 0x33f   :  { %673 = vmatpush.msrb.mxu2 %v1308_v5  ;;  %693 = vmatpush.msrb.mxu3 %v1306_v4 }
 0x341   :  { %674 = vmatpush.msrb.mxu2 %v1314_v8  ;;  %694 = vmatpush.msrb.mxu3 %v1312_v7 }
 0x343   :  { %675 = vmatpush.msrb.mxu2 %v1320_v12  ;;  %695 = vmatpush.msrb.mxu3 %v1318_v10 }
 0x345   :  { %676 = vmatpush.msrb.mxu2 %v1326_v18  ;;  %696 = vmatpush.msrb.mxu3 %v1324_v17 }
 0x347   :  { %677 = vmatpush.msrb.mxu2 %v1332_v22  ;;  %697 = vmatpush.msrb.mxu3 %v1330_v21 }
 0x349   :  { %678 = vmatpush.msrb.mxu2 %v1338_v24  ;;  %698 = vmatpush.msrb.mxu3 %v1336_v23 }
 0x3bd   :  { %v368_v38 = vpop.f32.mrf.mxu2  ;;  %v388_v39 = vpop.f32.mrf.mxu3 }
 0x3be   :  { %v393_v40 = vrot.slane %v368_v38, 6  ;;  %v394_v41 = vrot.slane %v388_v39, 6 }
 0x3c0   :  { %v397_v42 = vadd.f32 %v393_v40, %v1414_v34  ;;  %v398_v43 = vadd.f32 %v394_v41, %v1412_v33 }
 0x3c2   :  { %v399_v44 = vmul.f32 0.5, %v397_v42  ;;  %v400_v45 = vmul.f32 0.5, %v398_v43 }
 0x3c4   :  { %1006 = vtanh.f32 %v399_v44  ;;  %v402_v46 = vsel %vm198_vm1, %v398_v43, %v400_v45 }
 0x3c5   :  { %1008 = vtanh.f32 %v402_v46 }
 0x3ca   :  { %v1007_v47 = vpop.eup %1006 }
 0x3cb   :  { %v1009_v48 = vpop.eup %1008  ;;  %v405_v49 = vmul.f32 0.5, %v1007_v47 }
 0x3cc   :  { %v406_v50 = vmul.f32 0.5, %v1009_v48 }
 0x3cd   :  { %v407_v52 = vadd.f32 0.5, %v405_v49 }
 0x3ce   :  { %v408_v53 = vadd.f32 0.5, %v406_v50 }
 0x3cf   :  { %v414_v54 = vmul.f32 %v412_v51, %v407_v52 }
 0x3d0   :  { %v410_v56 = vsel %vm198_vm1, %v1009_v48, %v408_v53 }
 0x3d1   :  { %v415_v57 = vmul.f32 %v410_v56, %v407_v52 }
 0x3d3   :  { %417 = vrot.lane.b32.xlu2 %v415_v57, %s1235_s4 }
 0x42d   :  { %v418_v58 = vpop.permute.xlu2 %417 }
 0x42e   :  { %v420_v59 = vadd.f32 %v418_v58, %v414_v54 }
 0x430   :  { %1010 = vtanh.f32 %v420_v59 }
 0x436   :  { %v1011_v60 = vpop.eup %1010 }
 0x437   :  { %v1485_v61 = vmul.f32 %v1011_v60, %v410_v56 }
 0x439   :  { %v424_v63 = vrot.slane %v1485_v61, 2  ;;  %v816_v6 = vsel %vm815_vm4, %v814_v62, %v1485_v61 }
 0x43b   :  { %425 = vrot.lane.b32.xlu2 %v424_v63, %s1235_s4 }
 0x495   :  { %v426_v9 = vpop.permute.xlu2 %425 }
 0x496   :  { %967 = vmatmul.msk.f32.vlgmr.msra.gmra.mxu0 %vm201_vm2, %v426_v9  ;;  %968 = vmatmul.msk.f32.vlgmr.msra.gmra.mxu1 %vm201_vm2, %v426_v9 }
 0x497   :  { %749 = vmatpush.msra.mxu0 %v1298_v1  ;;  %769 = vmatpush.msra.mxu1 %v1296_v0 }
 0x499   :  { %750 = vmatpush.msra.mxu0 %v1304_v3  ;;  %770 = vmatpush.msra.mxu1 %v1300_v2 }
 0x49b   :  { %751 = vmatpush.msra.mxu0 %v1308_v5  ;;  %771 = vmatpush.msra.mxu1 %v1306_v4 }
 0x49d   :  { %752 = vmatpush.msra.mxu0 %v1314_v8  ;;  %772 = vmatpush.msra.mxu1 %v1312_v7 }
 0x49f   :  { %753 = vmatpush.msra.mxu0 %v1320_v12  ;;  %773 = vmatpush.msra.mxu1 %v1318_v10 }
 0x4a1   :  { %754 = vmatpush.msra.mxu0 %v1326_v18  ;;  %774 = vmatpush.msra.mxu1 %v1324_v17 }
 0x4a3   :  { %755 = vmatpush.msra.mxu0 %v1332_v22  ;;  %775 = vmatpush.msra.mxu1 %v1330_v21  ;;  %v490_v22 = vrot.slane %v420_v59, 7 }
 0x4a5   :  { %756 = vmatpush.msra.mxu0 %v1338_v24  ;;  %776 = vmatpush.msra.mxu1 %v1336_v23 }
 0x513   :  { %v446_v0 = vpop.f32.mrf.mxu0  ;;  %v466_v1 = vpop.f32.mrf.mxu1 }
 0x514   :  { %v471_v2 = vrot.slane %v446_v0, 5  ;;  %v472_v3 = vrot.slane %v466_v1, 5 }
 0x516   :  { %v475_v4 = vadd.f32 %v471_v2, %v1414_v34  ;;  %v476_v5 = vadd.f32 %v472_v3, %v1412_v33 }
 0x518   :  { %v477_v7 = vmul.f32 0.5, %v475_v4  ;;  %v478_v8 = vmul.f32 0.5, %v476_v5 }
 0x51a   :  { %1012 = vtanh.f32 %v477_v7  ;;  %v480_v10 = vsel %vm198_vm1, %v476_v5, %v478_v8 }
 0x51b   :  { %1014 = vtanh.f32 %v480_v10 }
 0x520   :  { %v1013_v12 = vpop.eup %1012 }
 0x521   :  { %v1015_v17 = vpop.eup %1014  ;;  %v483_v18 = vmul.f32 0.5, %v1013_v12 }
 0x522   :  { %v484_v21 = vmul.f32 0.5, %v1015_v17 }
 0x523   :  { %v485_v23 = vadd.f32 0.5, %v483_v18 }
 0x524   :  { %v486_v24 = vadd.f32 0.5, %v484_v21 }
 0x525   :  { %v492_v11 = vmul.f32 %v490_v22, %v485_v23 }
 0x526   :  { %v488_v13 = vsel %vm198_vm1, %v1015_v17, %v486_v24 }
 0x527   :  { %v493_v14 = vmul.f32 %v488_v13, %v485_v23 }
 0x529   :  { %495 = vrot.lane.b32.xlu0 %v493_v14, %s1235_s4 }
 0x59b   :  { %v496_v15 = vpop.permute.xlu0 %495 }
 0x59c   :  { %v498_v16 = vadd.f32 %v496_v15, %v492_v11 }
 0x59e   :  { %1016 = vtanh.f32 %v498_v16  ;;  %v568_v46 = vrot.slane %v498_v16, 7 }
 0x5a4   :  { %v1017_v19 = vpop.eup %1016 }
 0x5a5   :  { %v1519_v20 = vmul.f32 %v1017_v19, %v488_v13 }
 0x5a7   :  { %v502_v25 = vrot.slane %v1519_v20, 3  ;;  %v818_v26 = vsel %vm817_vm5, %v816_v6, %v1519_v20 }
 0x5a9   :  { %503 = vrot.lane.b32.xlu1 %v502_v25, %s1235_s4 }
 0x61b   :  { %v504_v27 = vpop.permute.xlu1 %503 }
 0x61c   :  { %969 = vmatmul.msk.f32.vlgmr.msra.gmra.mxu2 %vm201_vm2, %v504_v27  ;;  %970 = vmatmul.msk.f32.vlgmr.msra.gmra.mxu3 %vm201_vm2, %v504_v27 }
 0x69f   :  { %v524_v28 = vpop.f32.mrf.mxu2  ;;  %v544_v29 = vpop.f32.mrf.mxu3 }
 0x6a0   :  { %v549_v30 = vrot.slane %v524_v28, 4  ;;  %v550_v36 = vrot.slane %v544_v29, 4 }
 0x6a2   :  { %v553_v37 = vadd.f32 %v549_v30, %v1414_v34  ;;  %v554_v38 = vadd.f32 %v550_v36, %v1412_v33 }
 0x6a4   :  { %v555_v39 = vmul.f32 0.5, %v553_v37  ;;  %v556_v40 = vmul.f32 0.5, %v554_v38 }
 0x6a6   :  { %1018 = vtanh.f32 %v555_v39  ;;  %v558_v41 = vsel %vm198_vm1, %v554_v38, %v556_v40 }
 0x6a7   :  { %1020 = vtanh.f32 %v558_v41 }
 0x6ac   :  { %v1019_v42 = vpop.eup %1018 }
 0x6ad   :  { %v1021_v43 = vpop.eup %1020  ;;  %v561_v44 = vmul.f32 0.5, %v1019_v42 }
 0x6ae   :  { %v562_v45 = vmul.f32 0.5, %v1021_v43 }
 0x6af   :  { %v563_v47 = vadd.f32 0.5, %v561_v44 }
 0x6b0   :  { %v564_v48 = vadd.f32 0.5, %v562_v45 }
 0x6b1   :  { %v570_v49 = vmul.f32 %v568_v46, %v563_v47 }
 0x6b2   :  { %v566_v50 = vsel %vm198_vm1, %v1021_v43, %v564_v48 }
 0x6b3   :  { %v571_v51 = vmul.f32 %v566_v50, %v563_v47 }
 0x6b5   :  { %573 = vrot.lane.b32.xlu2 %v571_v51, %s1235_s4 }
 0x70f   :  { %v574_v52 = vpop.permute.xlu2 %573 }
 0x710   :  { %v576_v53 = vadd.f32 %v574_v52, %v570_v49 }
 0x712   :  { %1022 = vtanh.f32 %v576_v53  ;;  %v646_v10 = vrot.slane %v576_v53, 7 }
 0x718   :  { %v1023_v54 = vpop.eup %1022 }
 0x719   :  { %v1534_v56 = vmul.f32 %v1023_v54, %v566_v50 }
 0x71b   :  { %v580_v57 = vrot.slane %v1534_v56, 4  ;;  %v820_v58 = vsel %vm819_vm6, %v818_v26, %v1534_v56 }
 0x71d   :  { %581 = vrot.lane.b32.xlu0 %v580_v57, %s1235_s4 }
 0x78f   :  { %v582_v59 = vpop.permute.xlu0 %581 }
 0x790   :  { %971 = vmatmul.msk.f32.vlgmr.msrb.gmra.mxu0 %vm201_vm2, %v582_v59  ;;  %972 = vmatmul.msk.f32.vlgmr.msrb.gmra.mxu1 %vm201_vm2, %v582_v59 }
 0x80d   :  { %v602_v60 = vpop.f32.mrf.mxu0  ;;  %v622_v62 = vpop.f32.mrf.mxu1 }
 0x80e   :  { %v627_v63 = vrot.slane %v602_v60, 3  ;;  %v628_v6 = vrot.slane %v622_v62, 3 }
 0x810   :  { %v631_v9 = vadd.f32 %v627_v63, %v1414_v34  ;;  %v632_v0 = vadd.f32 %v628_v6, %v1412_v33 }
 0x812   :  { %v633_v1 = vmul.f32 0.5, %v631_v9  ;;  %v634_v2 = vmul.f32 0.5, %v632_v0 }
 0x814   :  { %1024 = vtanh.f32 %v633_v1  ;;  %v636_v3 = vsel %vm198_vm1, %v632_v0, %v634_v2 }
 0x815   :  { %1026 = vtanh.f32 %v636_v3 }
 0x81a   :  { %v1025_v4 = vpop.eup %1024 }
 0x81b   :  { %v1027_v5 = vpop.eup %1026  ;;  %v639_v7 = vmul.f32 0.5, %v1025_v4 }
 0x81c   :  { %v640_v8 = vmul.f32 0.5, %v1027_v5 }
 0x81d   :  { %v641_v12 = vadd.f32 0.5, %v639_v7 }
 0x81e   :  { %v642_v17 = vadd.f32 0.5, %v640_v8 }
 0x81f   :  { %v648_v18 = vmul.f32 %v646_v10, %v641_v12 }
 0x820   :  { %v644_v21 = vsel %vm198_vm1, %v1027_v5, %v642_v17  ;;  %v853_v17 = vld [vmem:[#allocation10 + $0x10] sm:$0xff] }
 0x821   :  { %v649_v22 = vmul.f32 %v644_v21, %v641_v12 }
 0x823   :  { %651 = vrot.lane.b32.xlu1 %v649_v22, %s1235_s4 }
 0x895   :  { %v652_v23 = vpop.permute.xlu1 %651 }
 0x896   :  { %v654_v24 = vadd.f32 %v652_v23, %v648_v18  ;;  %v852_v18 = vld [vmem:[#allocation10 + $0x8] sm:$0xff] }
 0x898   :  { %1028 = vtanh.f32 %v654_v24  ;;  %v724_v42 = vrot.slane %v654_v24, 7 }
 0x89e   :  { %v1029_v11 = vpop.eup %1028 }
 0x89f   :  { %v1549_v13 = vmul.f32 %v1029_v11, %v644_v21  ;;  %v851_v21 = vld [vmem:[#allocation10] sm:$0xff] }
 0x8a1   :  { %v658_v14 = vrot.slane %v1549_v13, 5  ;;  %v822_v15 = vsel %vm821_vm7, %v820_v58, %v1549_v13 }
 0x8a3   :  { %659 = vrot.lane.b32.xlu2 %v658_v14, %s1235_s4 }
 0x8fd   :  { %v660_v16 = vpop.permute.xlu2 %659 }
 0x8fe   :  { %973 = vmatmul.msk.f32.vlgmr.msrb.gmra.mxu2 %vm201_vm2, %v660_v16  ;;  %974 = vmatmul.msk.f32.vlgmr.msrb.gmra.mxu3 %vm201_vm2, %v660_v16  ;;  %v832_v16 = vrot.slane %v1549_v13, 3  ;;  %v842_v13 = vrot.slane %v1427_v55, 1 }
 0x981   :  { %v680_v19 = vpop.f32.mrf.mxu2  ;;  %v700_v25 = vpop.f32.mrf.mxu3 }
 0x982   :  { %v705_v26 = vrot.slane %v680_v19, 2  ;;  %v706_v27 = vrot.slane %v700_v25, 2  ;;  %v834_v19 = vrot.slane %v1534_v56, 1 }
 0x984   :  { %v709_v28 = vadd.f32 %v705_v26, %v1414_v34  ;;  %v710_v29 = vadd.f32 %v706_v27, %v1412_v33  ;;  %v836_v26 = vrot.slane %v1519_v20, 7  ;;  %v858_v20 = vld [vmem:[#allocation11 + $0x18] sm:$0xff] }
 0x985   :  { %876 = vmatpush.msra.mxu2 %v858_v20 }
 0x986   :  { %v711_v30 = vmul.f32 0.5, %v709_v28  ;;  %v712_v36 = vmul.f32 0.5, %v710_v29  ;;  %v838_v28 = vrot.slane %v1485_v61, 5  ;;  %v856_v61 = vld [vmem:[#allocation11 + $0x8] sm:$0xff] }
 0x988   :  { %1030 = vtanh.f32 %v711_v30  ;;  %v714_v37 = vsel %vm198_vm1, %v710_v29, %v712_v36  ;;  %v840_v30 = vrot.slane %v1456_v31, 3 }
 0x989   :  { %1032 = vtanh.f32 %v714_v37 }
 0x98e   :  { %v1031_v38 = vpop.eup %1030 }
 0x98f   :  { %v1033_v39 = vpop.eup %1032  ;;  %v717_v40 = vmul.f32 0.5, %v1031_v38 }
 0x990   :  { %v718_v41 = vmul.f32 0.5, %v1033_v39 }
 0x991   :  { %v719_v43 = vadd.f32 0.5, %v717_v40  ;;  %v855_v40 = vld [vmem:[#allocation11] sm:$0xff] }
 0x992   :  { %v720_v44 = vadd.f32 0.5, %v718_v41  ;;  %v993_v41 = vld [vmem:[%s1605_s6] ss:$0 sm:$0xff]  ;;  %s1237_s6 = smov [#allocation13]  }
 0x993   :  { %v726_v45 = vmul.f32 %v724_v42, %v719_v43  ;;  %s946_s10 = sshll.u32 %s1237_s6, 4  ;;  %s947_s10 = int_to_ptr.vmem [resolvable:$true] %s946_s10 }
 0x994   :  { %v722_v46 = vsel %vm198_vm1, %v1033_v39, %v720_v44  ;;  %v857_v39 = vld [vmem:[#allocation11 + $0x10] sm:$0xff] }
 0x995   :  { %v727_v47 = vmul.f32 %v722_v46, %v719_v43  ;;  %877 = vmatpush.msra.mxu2 %v857_v39 }
 0x997   :  { %729 = vrot.lane.b32.xlu0 %v727_v47, %s1235_s4  ;;  %878 = vmatpush.msra.mxu2 %v856_v61 }
 0x999   :  { %879 = vmatpush.msra.mxu2 %v855_v40 }
 0xa09   :  { %v730_v48 = vpop.permute.xlu0 %729 }
 0xa0a   :  { %v732_v49 = vadd.f32 %v730_v48, %v726_v45 }
 0xa0c   :  { %1034 = vtanh.f32 %v732_v49  ;;  %v802_v5 = vrot.slane %v732_v49, 7 }
 0xa12   :  { %v1035_v50 = vpop.eup %1034 }
 0xa13   :  { %v734_v51 = vmul.f32 %v1035_v50, %v722_v46 }
 0xa15   :  { %v736_v52 = vrot.slane %v734_v51, 6  ;;  %v824_v53 = vsel %vm823_vm8, %v822_v15, %v734_v51  ;;  %v830_v14 = vrot.slane %v734_v51, 5 }
 0xa17   :  { %737 = vrot.lane.b32.xlu1 %v736_v52, %s1235_s4 }
 0xa89   :  { %v738_v54 = vpop.permute.xlu1 %737 }
 0xa8a   :  { %975 = vmatmul.msk.f32.vlgmr.msra.gmra.mxu0 %vm201_vm2, %v738_v54  ;;  %976 = vmatmul.msk.f32.vlgmr.msra.gmra.mxu1 %vm201_vm2, %v738_v54 }
 0xb07   :  { %v758_v57 = vpop.f32.mrf.mxu0  ;;  %v778_v58 = vpop.f32.mrf.mxu1 }
 0xb08   :  { %v783_v59 = vrot.slane %v758_v57, 1  ;;  %v784_v60 = vrot.slane %v778_v58, 1 }
 0xb0a   :  { %v787_v62 = vadd.f32 %v783_v59, %v1414_v34  ;;  %v788_v63 = vadd.f32 %v784_v60, %v1412_v33  ;;  %v854_v33 = vld [vmem:[#allocation10 + $0x18] sm:$0xff] }
 0xb0b   :  { %901 = vmatpush.msra.mxu3 %v854_v33 }
 0xb0c   :  { %v789_v6 = vmul.f32 0.5, %v787_v62  ;;  %v790_v9 = vmul.f32 0.5, %v788_v63 }
 0xb0d   :  { %902 = vmatpush.msra.mxu3 %v853_v17 }
 0xb0e   :  { %1036 = vtanh.f32 %v789_v6  ;;  %v792_v0 = vsel %vm198_vm1, %v788_v63, %v790_v9 }
 0xb0f   :  { %1038 = vtanh.f32 %v792_v0  ;;  %903 = vmatpush.msra.mxu3 %v852_v18 }
 0xb11   :  { %904 = vmatpush.msra.mxu3 %v851_v21 }
 0xb14   :  { %v1037_v1 = vpop.eup %1036 }
 0xb15   :  { %v1039_v2 = vpop.eup %1038  ;;  %v795_v3 = vmul.f32 0.5, %v1037_v1 }
 0xb16   :  { %v796_v4 = vmul.f32 0.5, %v1039_v2 }
 0xb17   :  { %v797_v7 = vadd.f32 0.5, %v795_v3 }
 0xb18   :  { %v798_v8 = vadd.f32 0.5, %v796_v4 }
 0xb19   :  { %v804_v10 = vmul.f32 %v802_v5, %v797_v7 }
 0xb1a   :  { %v800_v34 = vsel %vm198_vm1, %v1039_v2, %v798_v8 }
 0xb1b   :  { %v805_v12 = vmul.f32 %v800_v34, %v797_v7 }
 0xb1d   :  { %807 = vrot.lane.b32.xlu2 %v805_v12, %s1235_s4 }
 0xb77   :  { %v808_v22 = vpop.permute.xlu2 %807 }
 0xb78   :  { %v810_v23 = vadd.f32 %v808_v22, %v804_v10 }
 0xb7a   :  { %1040 = vtanh.f32 %v810_v23 }
 0xb80   :  { %v1041_v24 = vpop.eup %1040 }
 0xb81   :  { %v812_v11 = vmul.f32 %v1041_v24, %v800_v34 }
 0xb83   :  { %v826_v35 = vsel %vm825_vm9, %v824_v53, %v812_v11  ;;  %v828_v15 = vrot.slane %v812_v11, 7 }
 0xb84   :  { %885 = vrot.lane.b32.xlu1 %v826_v35, %s1235_s4 }
 0xb85   :  { %v844_v25 = vsel %vm813_vm3, %v828_v15, %v830_v14 }
 0xb86   :  { %v845_v27 = vsel %vm815_vm4, %v844_v25, %v832_v16 }
 0xb87   :  { %v846_v29 = vsel %vm817_vm5, %v845_v27, %v834_v19 }
 0xb88   :  { %v847_v36 = vsel %vm819_vm6, %v846_v29, %v836_v26 }
 0xb89   :  { %v848_v37 = vsel %vm821_vm7, %v847_v36, %v838_v28 }
 0xb8a   :  { %v849_v56 = vsel %vm823_vm8, %v848_v37, %v840_v30 }
 0xb8b   :  { %v850_v38 = vsel %vm825_vm9, %v849_v56, %v842_v13 }
 0xb8c   :  { %860 = vrot.lane.b32.xlu0 %v850_v38, %s1236_s5 }
 0xbf6   :  { %v886_v31 = vpop.permute.xlu1 %885 }
 0xbf7   :  { %978 = vmatmul.msk.f32.vlgmr.msra.gmra.mxu3 %vm132_vm0, %v886_v31 }
 0xbfe   :  { %v861_v55 = vpop.permute.xlu0 %860 }
 0xbff   :  { %977 = vmatmul.msk.f32.vlgmr.msra.gmra.mxu2 %vm132_vm0, %v861_v55 }
 0xc7a   :  { %v906_v42 = vpop.f32.mrf.mxu3 }
 0xc82   :  { %v881_v43 = vpop.f32.mrf.mxu2 }
 0xc83   :  { %v907_v44 = vadd.f32 %v906_v42, %v881_v43 }
 0xc85   :  { %v913_v45 = vadd.f32 %v993_v41, %v907_v44 }
 0xc87   :  { %v917_v46 = vsel %vm914_vm10, %v913_v45, -1e+30 }
 0xc88   :  { %918 = vmax.xlane.f32.xlu2 %v917_v46 }
 0xcfb   :  { %v919_v47 = vpop.xlane.xlu2 %918 }
 0xcfc   :  { %v920_v48 = vsub.f32 %v917_v46, %v919_v47 }
 0xcfe   :  { %v921_v49 = vmul.f32 1.442695, %v920_v48 }
 0xd00   :  { %1042 = vpow2.f32 %v921_v49 }
 0xd06   :  { %v1043_v50 = vpop.eup %1042 }
 0xd07   :  { %923 = vadd.xlane.f32.xlu0 %v1043_v50 }
 0xd7a   :  { %v924_v51 = vpop.xlane.xlu0 %923 }
 0xd7b   :  { %1044 = vrcp.f32 %v924_v51  ;;  %v936_v57 = vand.u32 2147483648, %v924_v51  ;;  %v934_v59 = vand.u32 2147483647, %v924_v51  ;;  %vm930_vm12 = vweird.f32 %v924_v51 }
 0xd7d   :  { %v937_v32 = vor.u32 1.1754944e-38, %v936_v57  ;;  %vm935_vm14 = vcmp.eq.f32.partialorder %v934_v59, 8.507059e+37 }
 0xd81   :  { %v1045_v52 = vpop.eup %1044 }
 0xd82   :  { %v926_v53 = vmul.f32 %v1045_v52, %v924_v51  ;;  %vm931_vm11 = vweird.f32 %v1045_v52 }
 0xd83   :  { %vm932_vm13 = vmor %vm930_vm12, %vm931_vm11 }
 0xd84   :  { %v927_v54 = vsub.f32 1.0, %v926_v53 }
 0xd86   :  { %v928_v58 = vmul.f32 %v1045_v52, %v927_v54 }
 0xd88   :  { %v929_v60 = vadd.f32 %v1045_v52, %v928_v58 }
 0xd8a   :  { %v933_v62 = vsel %vm932_vm13, %v1045_v52, %v929_v60 }
 0xd8b   :  { %v938_v63 = vsel %vm935_vm14, %v937_v32, %v933_v62 }
 0xd8c   :  { %v939_v6 = vmul.f32 %v1043_v50, %v938_v63 }
 0xd8e   :  { %940 = vst [vmem:[#allocation13] sm:$0xff] %v939_v6 }
 0xd8f   :  { %951 = dma.vmem_to_hbm [thread:$0]  %s947_s10, 128, %s949_s13, [#allocation4]  }
 0xd90   :  { %1222 = dma.done.wait [#allocation4], 128  }
 0xd91   :  { %1223 = vsyncadd [#allocation4], 4294967168 }
 0xd92   :  { %956 = vsyncpa [#allocation3], 1 }
 0xd93   :  { %957 = vsyncpa [#allocation6], 1 }
 0xd94   :  { %958 = vsyncpa [#allocation9], 1 }
 0xd95   :  { %959 = vsyncpa [#allocation12], 1 }
 0xd96   :  { %960 = vsyncpa [#allocation4], 1 }

</bundles_post_ra>
